<compile_context>
chip_gen: v6e
topology: v6e:2x2x1
jax: 0.10.0
libtpu: 0.0.40
codegen_flags: <defaults>
</compile_context>

<pallas_src>
import functools

import jax
import jax.numpy as jnp
from jax.experimental import pallas as pl
from jax.experimental.pallas import tpu as pltpu


def _focal_loss_kernel(logits_ref, target_ref, out_ref, acc_ref, *,
                       gamma, n_total, tile_n):
    i = pl.program_id(0)

    @pl.when(i == 0)
    def _init():
        acc_ref[...] = jnp.zeros_like(acc_ref)

    x = logits_ref[...].astype(jnp.float32)          # (tile_n, C)
    t = target_ref[...]                              # (tile_n, 1) int32
    tn, c = x.shape

    # Numerically-stable softmax pieces: ONE exp per element (EUP), three
    # cross-lane reductions per row (XLU) -- max, sum(e), masked gather.
    m = jnp.max(x, axis=-1, keepdims=True)           # (tile_n, 1)
    e = jnp.exp(x - m)
    s = jnp.sum(e, axis=-1, keepdims=True)           # (tile_n, 1)

    # Gather the target logit per row via an iota mask (no lane gather on TPU).
    cols = jax.lax.broadcasted_iota(jnp.int32, (tn, c), 1)
    x_t = jnp.sum(jnp.where(cols == t, x, 0.0), axis=-1, keepdims=True)

    # Per-row focal term (all O(tile_n) work from here on).
    log_p_t = (x_t - m) - jnp.log(s)                 # (tile_n, 1)
    p_t = jnp.exp(log_p_t)
    q = 1.0 - p_t
    if gamma == 2.0:
        mod = q * q                                  # VPU mul, no EUP
    elif float(gamma) == int(gamma) and gamma >= 0:
        mod = jnp.ones_like(q)
        for _ in range(int(gamma)):
            mod = mod * q
    else:
        mod = jnp.power(q, jnp.float32(gamma))       # general fallback
    loss_row = -(mod * log_p_t)                      # (tile_n, 1)

    # Mask tail rows beyond the true N (partial last tile reads padding).
    row = i * tile_n + jax.lax.broadcasted_iota(jnp.int32, (tn, 1), 0)
    loss_row = jnp.where(row < n_total, loss_row, 0.0)

    # Elementwise vector accumulation: no per-step reduce / SMEM round-trip.
    acc_ref[...] += loss_row

    @pl.when(i == pl.num_programs(0) - 1)
    def _finish():
        out_ref[0, 0] = jnp.sum(acc_ref[...]) / jnp.float32(n_total)


def _round_down(x, m):
    return max(m, (x // m) * m)


def focal_loss(logits, targets, gamma=2.0, max_tile_n=16384):
    """logits: (N, C) float (f32/bf16), targets: (N,) int class ids -> scalar f32."""
    n, c = logits.shape
    itemsize = jnp.dtype(logits.dtype).itemsize
    targets_2d = targets.astype(jnp.int32).reshape(n, 1)

    # ---- Per-generation VMEM budget -> tile size ---------------------------
    try:
        phys_vmem = int(pltpu.get_tpu_info().vmem_capacity_bytes)
    except Exception:
        phys_vmem = 64 * 1024 * 1024          # conservative (v7x-sized) fallback
    # ~96 MiB scoped limit on 128 MiB chips (v5e/v6e), ~48 MiB on 64 MiB (v7x).
    vmem_limit = min(phys_vmem * 3 // 4, phys_vmem - (8 << 20))
    vmem_limit = max(vmem_limit, 16 << 20)
    usable = vmem_limit - (4 << 20)           # slack for Mosaic-internal scratch

    # Per-row VMEM cost:
    #   logits : 2 * C * itemsize      (double-buffered pipeline)
    #   targets: 2 * 128 * 4           ((tile_n,1) int32 lane-pads to 128 lanes)
    #   acc    : 128 * 4               ((tile_n,1) f32 scratch, lane-padded)
    #   temps  : 3 * C * 4             (f32 upcast / exp / mask temporaries)
    per_row = 2 * c * itemsize + 2 * 128 * 4 + 128 * 4 + 3 * c * 4
    sub = 16 if itemsize < 4 else 8           # sublane-packing multiple
    tile_n = max(usable // per_row, sub)
    tile_n = min(int(tile_n), int(max_tile_n))
    tile_n = _round_down(tile_n, sub)

    if n <= tile_n:
        tile_n = n                            # single full-array block
    num_tiles = pl.cdiv(n, tile_n)

    # Mem-bound cost hint for the XLA scheduler (targets block is lane-padded).
    bytes_accessed = n * c * itemsize + n * 128 * 4 + 4
    cost = pl.CostEstimate(flops=8 * n * c,
                           transcendentals=n * c + 2 * n,
                           bytes_accessed=bytes_accessed)

    out = pl.pallas_call(
        functools.partial(_focal_loss_kernel, gamma=float(gamma),
                          n_total=n, tile_n=tile_n),
        out_shape=jax.ShapeDtypeStruct((1, 1), jnp.float32),
        grid_spec=pltpu.PrefetchScalarGridSpec(
            num_scalar_prefetch=0,
            grid=(num_tiles,),
            in_specs=[
                pl.BlockSpec((tile_n, c), lambda i: (i, 0)),
                pl.BlockSpec((tile_n, 1), lambda i: (i, 0)),
            ],
            out_specs=pl.BlockSpec(memory_space=pltpu.MemorySpace.SMEM),
            scratch_shapes=[pltpu.VMEM((tile_n, 1), jnp.float32)],
        ),
        compiler_params=pltpu.CompilerParams(
            dimension_semantics=("arbitrary",),   # serial accumulator over N tiles
            vmem_limit_bytes=int(vmem_limit),
        ),
        cost_estimate=cost,
    )(logits, targets_2d)
    return out[0, 0]


def focal_loss_ref(logits, targets, gamma=2.0):
    """Pure-JAX reference mirroring the PyTorch module."""
    log_prob = jax.nn.log_softmax(logits.astype(jnp.float32), axis=-1)
    prob = jnp.exp(log_prob)
    focal = (1.0 - prob) ** gamma * log_prob
    picked = jnp.take_along_axis(focal, targets[:, None].astype(jnp.int32), axis=-1)
    return -jnp.mean(picked)


if __name__ == "__main__":
    key = jax.random.PRNGKey(0)
    k1, k2, k3, k4, k5, k6 = jax.random.split(key, 6)

    # Case 1: small single-tile path (typical (N, C) classification use).
    N1, C1 = 8, 128
    logits1 = jax.random.normal(k1, (N1, C1), dtype=jnp.float32)
    targets1 = jax.random.randint(k2, (N1,), 0, C1, dtype=jnp.int32)
    loss1 = focal_loss(logits1, targets1, gamma=2.0)
    jax.block_until_ready(loss1)
    ref1 = focal_loss_ref(logits1, targets1, gamma=2.0)
    assert jnp.allclose(loss1, ref1, atol=1e-5, rtol=1e-5), (loss1, ref1)

    # Case 2: multi-tile path with a masked tail (N=20, tile cap 8 -> 3 tiles).
    N2, C2 = 20, 128
    logits2 = jax.random.normal(k3, (N2, C2), dtype=jnp.float32)
    targets2 = jax.random.randint(k4, (N2,), 0, C2, dtype=jnp.int32)
    loss2 = focal_loss(logits2, targets2, gamma=2.0, max_tile_n=8)
    jax.block_until_ready(loss2)
    ref2 = focal_loss_ref(logits2, targets2, gamma=2.0)
    assert jnp.allclose(loss2, ref2, atol=1e-5, rtol=1e-5), (loss2, ref2)

    # Case 3: bf16 logits (in-kernel f32 upcast), single tile.
    N3, C3 = 16, 256
    logits3 = jax.random.normal(k5, (N3, C3), dtype=jnp.bfloat16)
    targets3 = jax.random.randint(k6, (N3,), 0, C3, dtype=jnp.int32)
    loss3 = focal_loss(logits3, targets3, gamma=2.0)
    jax.block_until_ready(loss3)
    ref3 = focal_loss_ref(logits3, targets3, gamma=2.0)
    assert jnp.allclose(loss3, ref3, atol=1e-4, rtol=1e-4), (loss3, ref3)

    print("KERNEL_OK")
</pallas_src>

<mosaic_0001>
module attributes {stable_mosaic.version = 11 : i64} {
  func.func @_focal_loss_kernel(%arg0: i32, %arg1: memref<8x128xf32, #tpu.memory_space<vmem>>, %arg2: memref<8x1xi32, #tpu.memory_space<vmem>>, %arg3: memref<1x1xf32, #tpu.memory_space<smem>>, %arg4: memref<8x1xf32, #tpu.memory_space<vmem>>) attributes {dimension_semantics = [#tpu.dimension_semantics<arbitrary>], iteration_bounds = array<i64: 1>, scalar_prefetch = 0 : i64, scratch_operands = 1 : i64, tpu.core_type = #tpu.core_type<tc>, window_params = [{transform_indices = @transform_0, window_bounds = array<i64: 8, 128>}, {transform_indices = @transform_1, window_bounds = array<i64: 8, 1>}, {transform_indices = @transform_2, window_bounds = array<i64: 1, 1>}]} {
    %c0_i32 = arith.constant 0 : i32
    %0 = arith.cmpi eq, %arg0, %c0_i32 : i32
    %1 = arith.extui %0 : i1 to i32
    %c0_i32_0 = arith.constant 0 : i32
    %2 = arith.cmpi ne, %1, %c0_i32_0 : i32
    scf.if %2 {
      %cst_17 = arith.constant 0.000000e+00 : f32
      %43 = vector.broadcast %cst_17 : f32 to vector<8x1xf32>
      %c0_18 = arith.constant 0 : index
      %c0_19 = arith.constant 0 : index
      %44 = vector.load %arg4[%c0_18, %c0_19] : memref<8x1xf32, #tpu.memory_space<vmem>>, vector<8x1xf32>
      tpu.vector_store %arg4[%c0_18, %c0_19], %43 {strides = array<i32>} : memref<8x1xf32, #tpu.memory_space<vmem>>, vector<8x1xf32>,
    } else {
    }
    %c0 = arith.constant 0 : index
    %c0_1 = arith.constant 0 : index
    %3 = vector.load %arg1[%c0, %c0_1] : memref<8x128xf32, #tpu.memory_space<vmem>>, vector<8x128xf32>
    %c0_2 = arith.constant 0 : index
    %c0_3 = arith.constant 0 : index
    %4 = vector.load %arg2[%c0_2, %c0_3] : memref<8x1xi32, #tpu.memory_space<vmem>>, vector<8x1xi32>
    %cst = arith.constant dense<0xFF800000> : vector<8xf32>
    %5 = vector.multi_reduction <maximumf>, %3, %cst [1] : vector<8x128xf32> to vector<8xf32>
    %6 = vector.shape_cast %5 : vector<8xf32> to vector<8x1xf32>
    %7 = vector.broadcast %6 : vector<8x1xf32> to vector<8x128xf32>
    %8 = arith.subf %3, %7 : vector<8x128xf32>
    %9 = math.exp %8 : vector<8x128xf32>
    %cst_4 = arith.constant dense<0.000000e+00> : vector<8xf32>
    %10 = vector.multi_reduction <add>, %9, %cst_4 [1] : vector<8x128xf32> to vector<8xf32>
    %11 = vector.shape_cast %10 : vector<8xf32> to vector<8x1xf32>
    %12 = tpu.iota {dimensions = array<i32: 1>} : vector<8x128xi32>
    %13 = vector.broadcast %4 : vector<8x1xi32> to vector<8x128xi32>
    %14 = arith.cmpi eq, %12, %13 : vector<8x128xi32>
    %cst_5 = arith.constant 0.000000e+00 : f32
    %15 = vector.broadcast %cst_5 : f32 to vector<8x128xf32>
    %16 = arith.select %14, %3, %15 : vector<8x128xi1>, vector<8x128xf32>
    %cst_6 = arith.constant dense<0.000000e+00> : vector<8xf32>
    %17 = vector.multi_reduction <add>, %16, %cst_6 [1] : vector<8x128xf32> to vector<8xf32>
    %18 = vector.shape_cast %17 : vector<8xf32> to vector<8x1xf32>
    %19 = arith.subf %18, %6 : vector<8x1xf32>
    %20 = math.log %11 : vector<8x1xf32>
    %21 = arith.subf %19, %20 : vector<8x1xf32>
    %22 = math.exp %21 : vector<8x1xf32>
    %cst_7 = arith.constant 1.000000e+00 : f32
    %23 = vector.broadcast %cst_7 : f32 to vector<8x1xf32>
    %24 = arith.subf %23, %22 : vector<8x1xf32>
    %25 = arith.mulf %24, %24 : vector<8x1xf32>
    %26 = arith.mulf %25, %21 : vector<8x1xf32>
    %cst_8 = arith.constant 0.000000e+00 : f32
    %27 = vector.broadcast %cst_8 : f32 to vector<8x1xf32>
    %28 = arith.subf %27, %26 : vector<8x1xf32>
    %c8_i32 = arith.constant 8 : i32
    %29 = arith.muli %arg0, %c8_i32 : i32
    %30 = tpu.iota {dimensions = array<i32: 0>} : vector<8x1xi32>
    %31 = vector.broadcast %29 : i32 to vector<8x1xi32>
    %32 = arith.addi %31, %30 : vector<8x1xi32>
    %c8_i32_9 = arith.constant 8 : i32
    %33 = vector.broadcast %c8_i32_9 : i32 to vector<8x1xi32>
    %34 = arith.cmpi slt, %32, %33 : vector<8x1xi32>
    %cst_10 = arith.constant 0.000000e+00 : f32
    %35 = vector.broadcast %cst_10 : f32 to vector<8x1xf32>
    %36 = arith.select %34, %28, %35 : vector<8x1xi1>, vector<8x1xf32>
    %c0_11 = arith.constant 0 : index
    %c0_12 = arith.constant 0 : index
    %37 = vector.load %arg4[%c0_11, %c0_12] : memref<8x1xf32, #tpu.memory_space<vmem>>, vector<8x1xf32>
    %38 = arith.addf %37, %36 : vector<8x1xf32>
    %c0_13 = arith.constant 0 : index
    %c0_14 = arith.constant 0 : index
    %39 = vector.load %arg4[%c0_13, %c0_14] : memref<8x1xf32, #tpu.memory_space<vmem>>, vector<8x1xf32>
    tpu.vector_store %arg4[%c0_13, %c0_14], %38 {strides = array<i32>} : memref<8x1xf32, #tpu.memory_space<vmem>>, vector<8x1xf32>,
    %c0_i32_15 = arith.constant 0 : i32
    %40 = arith.cmpi eq, %arg0, %c0_i32_15 : i32
    %41 = arith.extui %40 : i1 to i32
    %c0_i32_16 = arith.constant 0 : i32
    %42 = arith.cmpi ne, %41, %c0_i32_16 : i32
    scf.if %42 {
      %c0_17 = arith.constant 0 : index
      %c0_18 = arith.constant 0 : index
      %43 = vector.load %arg4[%c0_17, %c0_18] : memref<8x1xf32, #tpu.memory_space<vmem>>, vector<8x1xf32>
      %44 = vector.shape_cast %43 : vector<8x1xf32> to vector<1x8x1xf32>
      %cst_19 = arith.constant dense<0.000000e+00> : vector<1xf32>
      %45 = vector.multi_reduction <add>, %44, %cst_19 [1, 2] : vector<1x8x1xf32> to vector<1xf32>
      %46 = vector.shape_cast %45 : vector<1xf32> to vector<1x1x1xf32>
      %47 = vector.extract %46[0, 0, 0] : f32 from vector<1x1x1xf32>
      %cst_20 = arith.constant 8.000000e+00 : f32
      %48 = arith.divf %47, %cst_20 : f32
      %c0_21 = arith.constant 0 : index
      %c0_22 = arith.constant 0 : index
      %49 = memref.load %arg3[%c0_21, %c0_22] : memref<1x1xf32, #tpu.memory_space<smem>>
      memref.store %48, %arg3[%c0_21, %c0_22] : memref<1x1xf32, #tpu.memory_space<smem>>
    } else {
    }
    return
  }
  func.func @transform_0(%arg0: i32) -> (i32, i32) {
    %c0_i32 = arith.constant 0 : i32
    %c0_i32_0 = arith.constant 0 : i32
    return %arg0, %c0_i32 : i32, i32
  }
  func.func @transform_1(%arg0: i32) -> (i32, i32) {
    %c0_i32 = arith.constant 0 : i32
    %c0_i32_0 = arith.constant 0 : i32
    return %arg0, %c0_i32 : i32, i32
  }
  func.func @transform_2(%arg0: i32) -> (i32, i32) {
    %c0_i32 = arith.constant 0 : i32
    %c0_i32_0 = arith.constant 0 : i32
    %c0_i32_1 = arith.constant 0 : i32
    return %c0_i32, %c0_i32_0 : i32, i32
  }
}

</mosaic_0001>

<bundles_post_ra>
// kernel: tpu_custom_call.1
= control target key start
LH: loop header
LB: loop body
LE: loop exit
PB: predicated region body
PF: predicated region fallthrough
CT: control target
= control target key end

     0   :  { %s141_s0 = inlined_call_operand.vmem [shape: f32[8,128], index: 0, kind: input, shape index: {}]   ;;  %s142_s1 = inlined_call_operand.vmem [shape: s32[8,1], index: 1, kind: input, shape index: {}]   ;;  %s143_s2 = inlined_call_operand.hbm [shape: f32[1,1], index: 2, kind: output, shape index: {}]  }
   0x1   :  { %v18_v0 = vld [vmem:[%s141_s0] sm:$0xff] }
   0x2   :  { %7 = vsyncpa [#allocation4], 0  ;;  %20 = vmax.xlane.f32.xlu0 %v18_v0  ;;  %v111_v1 = vmov 0   ;;  %v19_v2 = vld [vmem:[%s142_s1] sm:$0xff]  ;;  %v27_v6 = vlaneseq  ;;  %vm16_vm1 = vcmask 7168   ;;  %v112_v11 = vmov 0.0  }
   0x3   :  { %94 = vset.pattern.permute.xlu0 %v111_v1  ;;  %17 = vst.msk [vmem:[#allocation2] sm:$0xff] %vm16_vm1, %v112_v11  ;;  %s113_s13 = smov [#allocation3]  }
   0x4   :  { %v28_v7 = vand.u32 127, %v27_v6 }
   0xa   :  { %v53_v23 = vld [vmem:[#allocation2] sm:$0xff] }
  0x18   :  { %30 = vperm.xlu0 %94, %v19_v2  }
  0x8b   :  { %v21_v3 = vpop.xlane.xlu0 %20 }
  0x8c   :  { %v22_v4 = vsub.f32 %v18_v0, %v21_v3 }
  0x8e   :  { %v23_v5 = vmul.f32 1.442695, %v22_v4 }
  0x90   :  { %95 = vpow2.f32 %v23_v5 }
  0x93   :  { %v31_v8 = vpop.permute.xlu0 %30 }
  0x94   :  { %vm32_vm0 = vcmp.eq.s32.totalorder %v28_v7, %v31_v8 }
  0x95   :  { %v33_v10 = vsel %vm32_vm0, %v18_v0, 0.0 }
  0x9d   :  { %v96_v9 = vpop.eup %95 }
  0x9e   :  { %25 = vadd.xlane.f32.xlu1 %v96_v9 }
  0xa2   :  { %34 = vadd.xlane.f32.xlu1 %v33_v10 }
 0x127   :  { %v26_v12 = vpop.xlane.xlu1 %25 }
 0x128   :  { %97 = vlog2.f32 %v26_v12 }
 0x12b   :  { %v35_v13 = vpop.xlane.xlu1 %34 }
 0x12c   :  { %v36_v16 = vsub.f32 %v35_v13, %v21_v3 }
 0x135   :  { %v98_v14 = vpop.eup %97 }
 0x136   :  { %v38_v15 = vmul.f32 0.6931472, %v98_v14 }
 0x138   :  { %v39_v17 = vsub.f32 %v36_v16, %v38_v15 }
 0x13a   :  { %v40_v18 = vmul.f32 1.442695, %v39_v17 }
 0x13c   :  { %99 = vpow2.f32 %v40_v18 }
 0x149   :  { %v100_v19 = vpop.eup %99 }
 0x14a   :  { %v42_v20 = vsub.f32 1.0, %v100_v19 }
 0x14c   :  { %v43_v21 = vmul.f32 %v42_v20, %v42_v20 }
 0x14e   :  { %v44_v22 = vmul.f32 %v43_v21, %v39_v17 }
 0x150   :  { %v45_v24 = vsub.f32 0.0, %v44_v22 }
 0x152   :  { %v54_v25 = vadd.f32 %v53_v23, %v45_v24 }
 0x154   :  { %56 = vst.msk [vmem:[#allocation2] sm:$0xff] %vm16_vm1, %v54_v25 }
 0x15b   :  { %v60_v26 = vld [vmem:[#allocation2] sm:$0xff] }
 0x15c   :  { %v61_v27 = vsel %vm16_vm1, %v60_v26, 0.0 }
 0x15d   :  { %62 = vadd.xlane.f32.xlu1 %v61_v27 }
 0x1e6   :  { %v63_v28 = vpop.xlane.xlu1 %62 }
 0x1e7   :  { %v64_v29 = vrot.slane %v63_v28, 4 }
 0x1e9   :  { %v65_v30 = vadd.f32 %v64_v29, %v63_v28 }
 0x1eb   :  { %v66_v31 = vrot.slane %v65_v30, 2 }
 0x1ed   :  { %v67_v32 = vadd.f32 %v66_v31, %v65_v30 }
 0x1ef   :  { %v68_v33 = vrot.slane %v67_v32, 1 }
 0x1f1   :  { %v69_v34 = vadd.f32 %v68_v33, %v67_v32 }
 0x1f3   :  { %89 = vpush %v69_v34 }
 0x224   :  { %s90_s0 = spop %89 }
 0x225   :  { %s73_s1 = smul.f32 0.125, %s90_s0 }
 0x227   :  { %75 = sst [smem:[#allocation3]] %s73_s1 }
 0x228   :  { %83 = dma.smem_to_hbm %s113_s13, 16, %s143_s2, [#allocation4]  }
 0x229   :  { %109 = dma.done.wait [#allocation4], 16  }
 0x22a   :  { %110 = vsyncadd [#allocation4], 4294967280 }
 0x22b   :  { %87 = sfence }
 0x22c   :  { %88 = vsyncpa [#allocation4], 1 }

</bundles_post_ra>
